<compile_context>
chip_gen: v5e
topology: v5e:2x2
jax: 0.10.0
libtpu: 0.0.40
codegen_flags: <defaults>
</compile_context>

<pallas_src>
import functools

import jax
import jax.numpy as jnp
from jax.experimental import pallas as pl
from jax.experimental.pallas import tpu as pltpu


def _round_up(x, m):
    return ((x + m - 1) // m) * m


def _stim_rollout_kernel(prev0_ref, din_ref, w_ref, i_ref, b_ref, fcw_ref,
                         fcb_ref, readout_ref, final_ref,
                         xproj_ref, rnn_ref, state_ref,
                         *, steps_per_block, total_steps, needs_mask):
    """One grid step = one block of `steps_per_block` RNN steps."""
    blk = pl.program_id(0)
    sb = steps_per_block
    bpad, npad = prev0_ref.shape

    @pl.when(blk == 0)
    def _():
        state_ref[...] = prev0_ref[...]

    # (1) Input projection for every step of the block in ONE MXU pass
    #     (state-independent):   xproj[s] = din[s] @ I^T + b
    din_flat = din_ref[...].reshape(sb * bpad, din_ref.shape[-1])
    xproj_ref[...] = (jnp.dot(din_flat, i_ref[...],
                              preferred_element_type=jnp.float32)
                      + b_ref[...])

    # (2) Serial recurrence: only prev @ W^T is on the critical path.
    #     Fully unrolled (sb is a compile-time constant) -> static slices.
    w = w_ref[...]
    prev = state_ref[...]
    for s in range(sb):
        x = jnp.dot(prev, w, preferred_element_type=jnp.float32)
        x = x + xproj_ref[s * bpad:(s + 1) * bpad, :]
        # TODO(synk): utils.ReTanh source unavailable; using ReTanh = max(tanh(x), 0).
        rnn = jnp.maximum(jnp.tanh(x), 0.0)
        rnn_ref[s * bpad:(s + 1) * bpad, :] = rnn
        if needs_mask:
            prev = jnp.where(blk * sb + s < total_steps, rnn, prev)
        else:
            prev = rnn
    state_ref[...] = prev

    # (3) Batched readout over the whole block in ONE MXU pass.
    ro = (jnp.dot(rnn_ref[...], fcw_ref[...],
                  preferred_element_type=jnp.float32) + fcb_ref[...])
    readout_ref[...] = ro.reshape(readout_ref.shape).astype(readout_ref.dtype)

    @pl.when(blk == pl.num_programs(0) - 1)
    def _():
        final_ref[...] = prev.astype(final_ref.dtype)


@jax.jit
def stim_model_rollout(din_seq, prev0, params):
    """Run T recurrent steps in one fused kernel.

    din_seq: (T, B, in_dim), prev0: (B, N).
    Returns (readouts (T, B, out_dim), final_state (B, N)).
    """
    T, B, in_dim = din_seq.shape
    N = params["W"].shape[0]
    out_dim = params["fc_w"].shape[0]
    f32 = jnp.float32

    BPAD = _round_up(max(B, 1), 8)       # sublane-aligned batch
    NPAD = _round_up(N, 128)             # 58  -> 128
    DPAD = _round_up(in_dim, 128)        # 8   -> 128
    OPAD = _round_up(out_dim, 128)       # 4   -> 128

    SB = min(T, 16)                      # steps fused (unrolled) per grid block
    num_blocks = pl.cdiv(T, SB)
    TPAD = num_blocks * SB
    needs_mask = (TPAD != T)

    # One-time weight packing: pre-transposed, zero-padded.
    w_t = jnp.zeros((NPAD, NPAD), f32).at[:N, :N].set(params["W"].T.astype(f32))
    i_t = jnp.zeros((DPAD, NPAD), f32).at[:in_dim, :N].set(
        params["I"].T.astype(f32))
    b_pad = jnp.zeros((1, NPAD), f32).at[0, :N].set(params["b"].astype(f32))
    fcw_t = jnp.zeros((NPAD, OPAD), f32).at[:N, :out_dim].set(
        params["fc_w"].T.astype(f32))
    fcb_pad = jnp.zeros((1, OPAD), f32).at[0, :out_dim].set(
        params["fc_b"].astype(f32))

    din_pad = jnp.zeros((TPAD, BPAD, DPAD), f32).at[:T, :B, :in_dim].set(
        din_seq.astype(f32))
    prev0_pad = jnp.zeros((BPAD, NPAD), f32).at[:B, :N].set(prev0.astype(f32))

    flops = (num_blocks * (2 * SB * BPAD * DPAD * NPAD        # input projection
                           + 2 * SB * BPAD * NPAD * OPAD)     # readout
             + TPAD * 2 * BPAD * NPAD * NPAD)                 # recurrence
    bytes_accessed = 4 * (din_pad.size + TPAD * BPAD * OPAD + prev0_pad.size
                          + BPAD * NPAD + w_t.size + i_t.size + fcw_t.size
                          + b_pad.size + fcb_pad.size)

    kernel = functools.partial(_stim_rollout_kernel, steps_per_block=SB,
                               total_steps=T, needs_mask=needs_mask)

    readouts_pad, final_pad = pl.pallas_call(
        kernel,
        out_shape=(
            jax.ShapeDtypeStruct((TPAD, BPAD, OPAD), f32),   # per-step readouts
            jax.ShapeDtypeStruct((BPAD, NPAD), f32),         # final state
        ),
        grid_spec=pltpu.PrefetchScalarGridSpec(
            num_scalar_prefetch=0,
            grid=(num_blocks,),
            in_specs=[
                pl.BlockSpec((BPAD, NPAD), lambda t: (0, 0)),          # prev0
                pl.BlockSpec((SB, BPAD, DPAD), lambda t: (t, 0, 0)),   # din block
                pl.BlockSpec((NPAD, NPAD), lambda t: (0, 0)),          # W^T
                pl.BlockSpec((DPAD, NPAD), lambda t: (0, 0)),          # I^T
                pl.BlockSpec((1, NPAD), lambda t: (0, 0)),             # b
                pl.BlockSpec((NPAD, OPAD), lambda t: (0, 0)),          # fc_w^T
                pl.BlockSpec((1, OPAD), lambda t: (0, 0)),             # fc_b
            ],
            out_specs=(
                pl.BlockSpec((SB, BPAD, OPAD), lambda t: (t, 0, 0)),   # stream out
                pl.BlockSpec((BPAD, NPAD), lambda t: (0, 0)),          # resident
            ),
            scratch_shapes=[
                pltpu.VMEM((SB * BPAD, NPAD), f32),   # xproj  (din @ I^T + b)
                pltpu.VMEM((SB * BPAD, NPAD), f32),   # rnn outputs of the block
                pltpu.VMEM((BPAD, NPAD), f32),        # recurrent state carry
            ],
        ),
        compiler_params=pltpu.CompilerParams(
            dimension_semantics=("arbitrary",)),
        cost_estimate=pl.CostEstimate(
            flops=flops,
            transcendentals=TPAD * BPAD * NPAD,
            bytes_accessed=bytes_accessed),
    )(prev0_pad, din_pad, w_t, i_t, b_pad, fcw_t, fcb_pad)

    return readouts_pad[:T, :B, :out_dim], final_pad[:B, :N]


def init_params(key, in_dim, out_dim, num_neurons):
    """Deterministic init mirroring StimModel.__init__."""
    kW, kI, kb, kfw, kfb = jax.random.split(key, 5)
    W = jax.random.normal(kW, (num_neurons, num_neurons), jnp.float32) / jnp.sqrt(
        jnp.float32(num_neurons))
    I = jax.random.normal(kI, (num_neurons, in_dim), jnp.float32) / jnp.sqrt(
        jnp.float32(in_dim))
    b = jax.random.uniform(kb, (num_neurons,), jnp.float32, -1.0, 1.0)
    # nn.Linear default init: U(-1/sqrt(fan_in), 1/sqrt(fan_in))
    bound = 1.0 / jnp.sqrt(jnp.float32(num_neurons))
    fc_w = jax.random.uniform(kfw, (out_dim, num_neurons), jnp.float32, -bound, bound)
    fc_b = jax.random.uniform(kfb, (out_dim,), jnp.float32, -bound, bound)
    return {"W": W, "I": I, "b": b, "fc_w": fc_w, "fc_b": fc_b}


def reference_rollout(din_seq, prev0, params):
    def step(prev, din):
        x = prev @ params["W"].T + din @ params["I"].T + params["b"]
        rnn = jnp.maximum(jnp.tanh(x), 0.0)
        readout = rnn @ params["fc_w"].T + params["fc_b"]
        return rnn, readout
    final, readouts = jax.lax.scan(step, prev0, din_seq)
    return readouts, final


if __name__ == "__main__":
    batch = 2
    in_dim = 8
    out_dim = 4
    num_neurons = in_dim + 50  # default: in_dim + 50 = 58
    T = 16                     # number of recurrent steps fused into one kernel

    key = jax.random.PRNGKey(0)
    kparams, kdin = jax.random.split(key)
    params = init_params(kparams, in_dim, out_dim, num_neurons)

    din_seq = jax.random.normal(kdin, (T, batch, in_dim), jnp.float32)
    # First call of the module: prev_output initialized to zeros.
    prev0 = jnp.zeros((batch, num_neurons), jnp.float32)

    readouts, final_state = stim_model_rollout(din_seq, prev0, params)
    readouts = jax.block_until_ready(readouts)
    final_state = jax.block_until_ready(final_state)

    ref_readouts, ref_final = reference_rollout(din_seq, prev0, params)

    assert readouts.shape == (T, batch, out_dim)
    assert final_state.shape == (batch, num_neurons)
    assert jnp.allclose(readouts, ref_readouts, atol=1e-5, rtol=1e-5)
    assert jnp.allclose(final_state, ref_final, atol=1e-5, rtol=1e-5)

    print("KERNEL_OK")
</pallas_src>

<mosaic_0001>
module attributes {stable_mosaic.version = 11 : i64} {
  func.func @_stim_rollout_kernel(%arg0: i32, %arg1: memref<8x128xf32, #tpu.memory_space<vmem>>, %arg2: memref<16x8x128xf32, #tpu.memory_space<vmem>>, %arg3: memref<128x128xf32, #tpu.memory_space<vmem>>, %arg4: memref<128x128xf32, #tpu.memory_space<vmem>>, %arg5: memref<1x128xf32, #tpu.memory_space<vmem>>, %arg6: memref<128x128xf32, #tpu.memory_space<vmem>>, %arg7: memref<1x128xf32, #tpu.memory_space<vmem>>, %arg8: memref<16x8x128xf32, #tpu.memory_space<vmem>>, %arg9: memref<8x128xf32, #tpu.memory_space<vmem>>, %arg10: memref<128x128xf32, #tpu.memory_space<vmem>>, %arg11: memref<128x128xf32, #tpu.memory_space<vmem>>, %arg12: memref<8x128xf32, #tpu.memory_space<vmem>>) attributes {dimension_semantics = [#tpu.dimension_semantics<arbitrary>], iteration_bounds = array<i64: 1>, scalar_prefetch = 0 : i64, scratch_operands = 3 : i64, tpu.core_type = #tpu.core_type<tc>, window_params = [{pipeline_mode = #tpu.pipeline_mode<synchronous>, transform_indices = @transform_0, window_bounds = array<i64: 8, 128>}, {transform_indices = @transform_1, window_bounds = array<i64: 16, 8, 128>}, {pipeline_mode = #tpu.pipeline_mode<synchronous>, transform_indices = @transform_2, window_bounds = array<i64: 128, 128>}, {pipeline_mode = #tpu.pipeline_mode<synchronous>, transform_indices = @transform_3, window_bounds = array<i64: 128, 128>}, {pipeline_mode = #tpu.pipeline_mode<synchronous>, transform_indices = @transform_4, window_bounds = array<i64: 1, 128>}, {pipeline_mode = #tpu.pipeline_mode<synchronous>, transform_indices = @transform_5, window_bounds = array<i64: 128, 128>}, {pipeline_mode = #tpu.pipeline_mode<synchronous>, transform_indices = @transform_6, window_bounds = array<i64: 1, 128>}, {transform_indices = @transform_7, window_bounds = array<i64: 16, 8, 128>}, {pipeline_mode = #tpu.pipeline_mode<synchronous>, transform_indices = @transform_8, window_bounds = array<i64: 8, 128>}]} {
    %c0_i32 = arith.constant 0 : i32
    %0 = arith.cmpi eq, %arg0, %c0_i32 : i32
    %1 = arith.extui %0 : i1 to i32
    %c0_i32_0 = arith.constant 0 : i32
    %2 = arith.cmpi ne, %1, %c0_i32_0 : i32
    scf.if %2 {
      %c0_108 = arith.constant 0 : index
      %c0_109 = arith.constant 0 : index
      %137 = vector.load %arg1[%c0_108, %c0_109] : memref<8x128xf32, #tpu.memory_space<vmem>>, vector<8x128xf32>
      %c0_110 = arith.constant 0 : index
      %c0_111 = arith.constant 0 : index
      %138 = vector.load %arg12[%c0_110, %c0_111] : memref<8x128xf32, #tpu.memory_space<vmem>>, vector<8x128xf32>
      tpu.vector_store %arg12[%c0_110, %c0_111], %137 {strides = array<i32>} : memref<8x128xf32, #tpu.memory_space<vmem>>, vector<8x128xf32>,
    } else {
    }
    %c0 = arith.constant 0 : index
    %c0_1 = arith.constant 0 : index
    %c0_2 = arith.constant 0 : index
    %3 = vector.load %arg2[%c0, %c0_1, %c0_2] : memref<16x8x128xf32, #tpu.memory_space<vmem>>, vector<16x8x128xf32>
    %4 = vector.shape_cast %3 : vector<16x8x128xf32> to vector<128x128xf32>
    %c0_3 = arith.constant 0 : index
    %c0_4 = arith.constant 0 : index
    %5 = vector.load %arg4[%c0_3, %c0_4] : memref<128x128xf32, #tpu.memory_space<vmem>>, vector<128x128xf32>
    %cst = arith.constant dense<0.000000e+00> : vector<128x128xf32>
    %6 = tpu.matmul %4, %5, %cst {dimension_numbers = #tpu.dot_dimension_numbers<[1], [0], [0], [1], [0, 0, 1, 1], [], []>} : vector<128x128xf32>, vector<128x128xf32>, vector<128x128xf32> -> vector<128x128xf32>
    %c0_5 = arith.constant 0 : index
    %c0_6 = arith.constant 0 : index
    %7 = vector.load %arg5[%c0_5, %c0_6] : memref<1x128xf32, #tpu.memory_space<vmem>>, vector<1x128xf32>
    %8 = vector.broadcast %7 : vector<1x128xf32> to vector<128x128xf32>
    %9 = arith.addf %6, %8 : vector<128x128xf32>
    %c0_7 = arith.constant 0 : index
    %c0_8 = arith.constant 0 : index
    %10 = vector.load %arg10[%c0_7, %c0_8] : memref<128x128xf32, #tpu.memory_space<vmem>>, vector<128x128xf32>
    tpu.vector_store %arg10[%c0_7, %c0_8], %9 {strides = array<i32>} : memref<128x128xf32, #tpu.memory_space<vmem>>, vector<128x128xf32>,
    %c0_9 = arith.constant 0 : index
    %c0_10 = arith.constant 0 : index
    %11 = vector.load %arg3[%c0_9, %c0_10] : memref<128x128xf32, #tpu.memory_space<vmem>>, vector<128x128xf32>
    %c0_11 = arith.constant 0 : index
    %c0_12 = arith.constant 0 : index
    %12 = vector.load %arg12[%c0_11, %c0_12] : memref<8x128xf32, #tpu.memory_space<vmem>>, vector<8x128xf32>
    %cst_13 = arith.constant dense<0.000000e+00> : vector<8x128xf32>
    %13 = tpu.matmul %12, %11, %cst_13 {dimension_numbers = #tpu.dot_dimension_numbers<[1], [0], [0], [1], [0, 0, 1, 1], [], []>} : vector<8x128xf32>, vector<128x128xf32>, vector<8x128xf32> -> vector<8x128xf32>
    %c0_14 = arith.constant 0 : index
    %c0_15 = arith.constant 0 : index
    %14 = vector.load %arg10[%c0_14, %c0_15] : memref<128x128xf32, #tpu.memory_space<vmem>>, vector<8x128xf32>
    %15 = arith.addf %13, %14 : vector<8x128xf32>
    %16 = math.tanh %15 : vector<8x128xf32>
    %cst_16 = arith.constant 0.000000e+00 : f32
    %17 = vector.broadcast %cst_16 : f32 to vector<8x128xf32>
    %18 = arith.maximumf %16, %17 : vector<8x128xf32>
    %c0_17 = arith.constant 0 : index
    %c0_18 = arith.constant 0 : index
    %19 = vector.load %arg11[%c0_17, %c0_18] : memref<128x128xf32, #tpu.memory_space<vmem>>, vector<8x128xf32>
    tpu.vector_store %arg11[%c0_17, %c0_18], %18 {strides = array<i32>} : memref<128x128xf32, #tpu.memory_space<vmem>>, vector<8x128xf32>,
    %cst_19 = arith.constant dense<0.000000e+00> : vector<8x128xf32>
    %20 = tpu.matmul %18, %11, %cst_19 {dimension_numbers = #tpu.dot_dimension_numbers<[1], [0], [0], [1], [0, 0, 1, 1], [], []>} : vector<8x128xf32>, vector<128x128xf32>, vector<8x128xf32> -> vector<8x128xf32>
    %c8 = arith.constant 8 : index
    %c0_20 = arith.constant 0 : index
    %21 = vector.load %arg10[%c8, %c0_20] : memref<128x128xf32, #tpu.memory_space<vmem>>, vector<8x128xf32>
    %22 = arith.addf %20, %21 : vector<8x128xf32>
    %23 = math.tanh %22 : vector<8x128xf32>
    %cst_21 = arith.constant 0.000000e+00 : f32
    %24 = vector.broadcast %cst_21 : f32 to vector<8x128xf32>
    %25 = arith.maximumf %23, %24 : vector<8x128xf32>
    %c8_22 = arith.constant 8 : index
    %c0_23 = arith.constant 0 : index
    %26 = vector.load %arg11[%c8_22, %c0_23] : memref<128x128xf32, #tpu.memory_space<vmem>>, vector<8x128xf32>
    tpu.vector_store %arg11[%c8_22, %c0_23], %25 {strides = array<i32>} : memref<128x128xf32, #tpu.memory_space<vmem>>, vector<8x128xf32>,
    %cst_24 = arith.constant dense<0.000000e+00> : vector<8x128xf32>
    %27 = tpu.matmul %25, %11, %cst_24 {dimension_numbers = #tpu.dot_dimension_numbers<[1], [0], [0], [1], [0, 0, 1, 1], [], []>} : vector<8x128xf32>, vector<128x128xf32>, vector<8x128xf32> -> vector<8x128xf32>
    %c16 = arith.constant 16 : index
    %c0_25 = arith.constant 0 : index
    %28 = vector.load %arg10[%c16, %c0_25] : memref<128x128xf32, #tpu.memory_space<vmem>>, vector<8x128xf32>
    %29 = arith.addf %27, %28 : vector<8x128xf32>
    %30 = math.tanh %29 : vector<8x128xf32>
    %cst_26 = arith.constant 0.000000e+00 : f32
    %31 = vector.broadcast %cst_26 : f32 to vector<8x128xf32>
    %32 = arith.maximumf %30, %31 : vector<8x128xf32>
    %c16_27 = arith.constant 16 : index
    %c0_28 = arith.constant 0 : index
    %33 = vector.load %arg11[%c16_27, %c0_28] : memref<128x128xf32, #tpu.memory_space<vmem>>, vector<8x128xf32>
    tpu.vector_store %arg11[%c16_27, %c0_28], %32 {strides = array<i32>} : memref<128x128xf32, #tpu.memory_space<vmem>>, vector<8x128xf32>,
    %cst_29 = arith.constant dense<0.000000e+00> : vector<8x128xf32>
    %34 = tpu.matmul %32, %11, %cst_29 {dimension_numbers = #tpu.dot_dimension_numbers<[1], [0], [0], [1], [0, 0, 1, 1], [], []>} : vector<8x128xf32>, vector<128x128xf32>, vector<8x128xf32> -> vector<8x128xf32>
    %c24 = arith.constant 24 : index
    %c0_30 = arith.constant 0 : index
    %35 = vector.load %arg10[%c24, %c0_30] : memref<128x128xf32, #tpu.memory_space<vmem>>, vector<8x128xf32>
    %36 = arith.addf %34, %35 : vector<8x128xf32>
    %37 = math.tanh %36 : vector<8x128xf32>
    %cst_31 = arith.constant 0.000000e+00 : f32
    %38 = vector.broadcast %cst_31 : f32 to vector<8x128xf32>
    %39 = arith.maximumf %37, %38 : vector<8x128xf32>
    %c24_32 = arith.constant 24 : index
    %c0_33 = arith.constant 0 : index
    %40 = vector.load %arg11[%c24_32, %c0_33] : memref<128x128xf32, #tpu.memory_space<vmem>>, vector<8x128xf32>
    tpu.vector_store %arg11[%c24_32, %c0_33], %39 {strides = array<i32>} : memref<128x128xf32, #tpu.memory_space<vmem>>, vector<8x128xf32>,
    %cst_34 = arith.constant dense<0.000000e+00> : vector<8x128xf32>
    %41 = tpu.matmul %39, %11, %cst_34 {dimension_numbers = #tpu.dot_dimension_numbers<[1], [0], [0], [1], [0, 0, 1, 1], [], []>} : vector<8x128xf32>, vector<128x128xf32>, vector<8x128xf32> -> vector<8x128xf32>
    %c32 = arith.constant 32 : index
    %c0_35 = arith.constant 0 : index
    %42 = vector.load %arg10[%c32, %c0_35] : memref<128x128xf32, #tpu.memory_space<vmem>>, vector<8x128xf32>
    %43 = arith.addf %41, %42 : vector<8x128xf32>
    %44 = math.tanh %43 : vector<8x128xf32>
    %cst_36 = arith.constant 0.000000e+00 : f32
    %45 = vector.broadcast %cst_36 : f32 to vector<8x128xf32>
    %46 = arith.maximumf %44, %45 : vector<8x128xf32>
    %c32_37 = arith.constant 32 : index
    %c0_38 = arith.constant 0 : index
    %47 = vector.load %arg11[%c32_37, %c0_38] : memref<128x128xf32, #tpu.memory_space<vmem>>, vector<8x128xf32>
    tpu.vector_store %arg11[%c32_37, %c0_38], %46 {strides = array<i32>} : memref<128x128xf32, #tpu.memory_space<vmem>>, vector<8x128xf32>,
    %cst_39 = arith.constant dense<0.000000e+00> : vector<8x128xf32>
    %48 = tpu.matmul %46, %11, %cst_39 {dimension_numbers = #tpu.dot_dimension_numbers<[1], [0], [0], [1], [0, 0, 1, 1], [], []>} : vector<8x128xf32>, vector<128x128xf32>, vector<8x128xf32> -> vector<8x128xf32>
    %c40 = arith.constant 40 : index
    %c0_40 = arith.constant 0 : index
    %49 = vector.load %arg10[%c40, %c0_40] : memref<128x128xf32, #tpu.memory_space<vmem>>, vector<8x128xf32>
    %50 = arith.addf %48, %49 : vector<8x128xf32>
    %51 = math.tanh %50 : vector<8x128xf32>
    %cst_41 = arith.constant 0.000000e+00 : f32
    %52 = vector.broadcast %cst_41 : f32 to vector<8x128xf32>
    %53 = arith.maximumf %51, %52 : vector<8x128xf32>
    %c40_42 = arith.constant 40 : index
    %c0_43 = arith.constant 0 : index
    %54 = vector.load %arg11[%c40_42, %c0_43] : memref<128x128xf32, #tpu.memory_space<vmem>>, vector<8x128xf32>
    tpu.vector_store %arg11[%c40_42, %c0_43], %53 {strides = array<i32>} : memref<128x128xf32, #tpu.memory_space<vmem>>, vector<8x128xf32>,
    %cst_44 = arith.constant dense<0.000000e+00> : vector<8x128xf32>
    %55 = tpu.matmul %53, %11, %cst_44 {dimension_numbers = #tpu.dot_dimension_numbers<[1], [0], [0], [1], [0, 0, 1, 1], [], []>} : vector<8x128xf32>, vector<128x128xf32>, vector<8x128xf32> -> vector<8x128xf32>
    %c48 = arith.constant 48 : index
    %c0_45 = arith.constant 0 : index
    %56 = vector.load %arg10[%c48, %c0_45] : memref<128x128xf32, #tpu.memory_space<vmem>>, vector<8x128xf32>
    %57 = arith.addf %55, %56 : vector<8x128xf32>
    %58 = math.tanh %57 : vector<8x128xf32>
    %cst_46 = arith.constant 0.000000e+00 : f32
    %59 = vector.broadcast %cst_46 : f32 to vector<8x128xf32>
    %60 = arith.maximumf %58, %59 : vector<8x128xf32>
    %c48_47 = arith.constant 48 : index
    %c0_48 = arith.constant 0 : index
    %61 = vector.load %arg11[%c48_47, %c0_48] : memref<128x128xf32, #tpu.memory_space<vmem>>, vector<8x128xf32>
    tpu.vector_store %arg11[%c48_47, %c0_48], %60 {strides = array<i32>} : memref<128x128xf32, #tpu.memory_space<vmem>>, vector<8x128xf32>,
    %cst_49 = arith.constant dense<0.000000e+00> : vector<8x128xf32>
    %62 = tpu.matmul %60, %11, %cst_49 {dimension_numbers = #tpu.dot_dimension_numbers<[1], [0], [0], [1], [0, 0, 1, 1], [], []>} : vector<8x128xf32>, vector<128x128xf32>, vector<8x128xf32> -> vector<8x128xf32>
    %c56 = arith.constant 56 : index
    %c0_50 = arith.constant 0 : index
    %63 = vector.load %arg10[%c56, %c0_50] : memref<128x128xf32, #tpu.memory_space<vmem>>, vector<8x128xf32>
    %64 = arith.addf %62, %63 : vector<8x128xf32>
    %65 = math.tanh %64 : vector<8x128xf32>
    %cst_51 = arith.constant 0.000000e+00 : f32
    %66 = vector.broadcast %cst_51 : f32 to vector<8x128xf32>
    %67 = arith.maximumf %65, %66 : vector<8x128xf32>
    %c56_52 = arith.constant 56 : index
    %c0_53 = arith.constant 0 : index
    %68 = vector.load %arg11[%c56_52, %c0_53] : memref<128x128xf32, #tpu.memory_space<vmem>>, vector<8x128xf32>
    tpu.vector_store %arg11[%c56_52, %c0_53], %67 {strides = array<i32>} : memref<128x128xf32, #tpu.memory_space<vmem>>, vector<8x128xf32>,
    %cst_54 = arith.constant dense<0.000000e+00> : vector<8x128xf32>
    %69 = tpu.matmul %67, %11, %cst_54 {dimension_numbers = #tpu.dot_dimension_numbers<[1], [0], [0], [1], [0, 0, 1, 1], [], []>} : vector<8x128xf32>, vector<128x128xf32>, vector<8x128xf32> -> vector<8x128xf32>
    %c64 = arith.constant 64 : index
    %c0_55 = arith.constant 0 : index
    %70 = vector.load %arg10[%c64, %c0_55] : memref<128x128xf32, #tpu.memory_space<vmem>>, vector<8x128xf32>
    %71 = arith.addf %69, %70 : vector<8x128xf32>
    %72 = math.tanh %71 : vector<8x128xf32>
    %cst_56 = arith.constant 0.000000e+00 : f32
    %73 = vector.broadcast %cst_56 : f32 to vector<8x128xf32>
    %74 = arith.maximumf %72, %73 : vector<8x128xf32>
    %c64_57 = arith.constant 64 : index
    %c0_58 = arith.constant 0 : index
    %75 = vector.load %arg11[%c64_57, %c0_58] : memref<128x128xf32, #tpu.memory_space<vmem>>, vector<8x128xf32>
    tpu.vector_store %arg11[%c64_57, %c0_58], %74 {strides = array<i32>} : memref<128x128xf32, #tpu.memory_space<vmem>>, vector<8x128xf32>,
    %cst_59 = arith.constant dense<0.000000e+00> : vector<8x128xf32>
    %76 = tpu.matmul %74, %11, %cst_59 {dimension_numbers = #tpu.dot_dimension_numbers<[1], [0], [0], [1], [0, 0, 1, 1], [], []>} : vector<8x128xf32>, vector<128x128xf32>, vector<8x128xf32> -> vector<8x128xf32>
    %c72 = arith.constant 72 : index
    %c0_60 = arith.constant 0 : index
    %77 = vector.load %arg10[%c72, %c0_60] : memref<128x128xf32, #tpu.memory_space<vmem>>, vector<8x128xf32>
    %78 = arith.addf %76, %77 : vector<8x128xf32>
    %79 = math.tanh %78 : vector<8x128xf32>
    %cst_61 = arith.constant 0.000000e+00 : f32
    %80 = vector.broadcast %cst_61 : f32 to vector<8x128xf32>
    %81 = arith.maximumf %79, %80 : vector<8x128xf32>
    %c72_62 = arith.constant 72 : index
    %c0_63 = arith.constant 0 : index
    %82 = vector.load %arg11[%c72_62, %c0_63] : memref<128x128xf32, #tpu.memory_space<vmem>>, vector<8x128xf32>
    tpu.vector_store %arg11[%c72_62, %c0_63], %81 {strides = array<i32>} : memref<128x128xf32, #tpu.memory_space<vmem>>, vector<8x128xf32>,
    %cst_64 = arith.constant dense<0.000000e+00> : vector<8x128xf32>
    %83 = tpu.matmul %81, %11, %cst_64 {dimension_numbers = #tpu.dot_dimension_numbers<[1], [0], [0], [1], [0, 0, 1, 1], [], []>} : vector<8x128xf32>, vector<128x128xf32>, vector<8x128xf32> -> vector<8x128xf32>
    %c80 = arith.constant 80 : index
    %c0_65 = arith.constant 0 : index
    %84 = vector.load %arg10[%c80, %c0_65] : memref<128x128xf32, #tpu.memory_space<vmem>>, vector<8x128xf32>
    %85 = arith.addf %83, %84 : vector<8x128xf32>
    %86 = math.tanh %85 : vector<8x128xf32>
    %cst_66 = arith.constant 0.000000e+00 : f32
    %87 = vector.broadcast %cst_66 : f32 to vector<8x128xf32>
    %88 = arith.maximumf %86, %87 : vector<8x128xf32>
    %c80_67 = arith.constant 80 : index
    %c0_68 = arith.constant 0 : index
    %89 = vector.load %arg11[%c80_67, %c0_68] : memref<128x128xf32, #tpu.memory_space<vmem>>, vector<8x128xf32>
    tpu.vector_store %arg11[%c80_67, %c0_68], %88 {strides = array<i32>} : memref<128x128xf32, #tpu.memory_space<vmem>>, vector<8x128xf32>,
    %cst_69 = arith.constant dense<0.000000e+00> : vector<8x128xf32>
    %90 = tpu.matmul %88, %11, %cst_69 {dimension_numbers = #tpu.dot_dimension_numbers<[1], [0], [0], [1], [0, 0, 1, 1], [], []>} : vector<8x128xf32>, vector<128x128xf32>, vector<8x128xf32> -> vector<8x128xf32>
    %c88 = arith.constant 88 : index
    %c0_70 = arith.constant 0 : index
    %91 = vector.load %arg10[%c88, %c0_70] : memref<128x128xf32, #tpu.memory_space<vmem>>, vector<8x128xf32>
    %92 = arith.addf %90, %91 : vector<8x128xf32>
    %93 = math.tanh %92 : vector<8x128xf32>
    %cst_71 = arith.constant 0.000000e+00 : f32
    %94 = vector.broadcast %cst_71 : f32 to vector<8x128xf32>
    %95 = arith.maximumf %93, %94 : vector<8x128xf32>
    %c88_72 = arith.constant 88 : index
    %c0_73 = arith.constant 0 : index
    %96 = vector.load %arg11[%c88_72, %c0_73] : memref<128x128xf32, #tpu.memory_space<vmem>>, vector<8x128xf32>
    tpu.vector_store %arg11[%c88_72, %c0_73], %95 {strides = array<i32>} : memref<128x128xf32, #tpu.memory_space<vmem>>, vector<8x128xf32>,
    %cst_74 = arith.constant dense<0.000000e+00> : vector<8x128xf32>
    %97 = tpu.matmul %95, %11, %cst_74 {dimension_numbers = #tpu.dot_dimension_numbers<[1], [0], [0], [1], [0, 0, 1, 1], [], []>} : vector<8x128xf32>, vector<128x128xf32>, vector<8x128xf32> -> vector<8x128xf32>
    %c96 = arith.constant 96 : index
    %c0_75 = arith.constant 0 : index
    %98 = vector.load %arg10[%c96, %c0_75] : memref<128x128xf32, #tpu.memory_space<vmem>>, vector<8x128xf32>
    %99 = arith.addf %97, %98 : vector<8x128xf32>
    %100 = math.tanh %99 : vector<8x128xf32>
    %cst_76 = arith.constant 0.000000e+00 : f32
    %101 = vector.broadcast %cst_76 : f32 to vector<8x128xf32>
    %102 = arith.maximumf %100, %101 : vector<8x128xf32>
    %c96_77 = arith.constant 96 : index
    %c0_78 = arith.constant 0 : index
    %103 = vector.load %arg11[%c96_77, %c0_78] : memref<128x128xf32, #tpu.memory_space<vmem>>, vector<8x128xf32>
    tpu.vector_store %arg11[%c96_77, %c0_78], %102 {strides = array<i32>} : memref<128x128xf32, #tpu.memory_space<vmem>>, vector<8x128xf32>,
    %cst_79 = arith.constant dense<0.000000e+00> : vector<8x128xf32>
    %104 = tpu.matmul %102, %11, %cst_79 {dimension_numbers = #tpu.dot_dimension_numbers<[1], [0], [0], [1], [0, 0, 1, 1], [], []>} : vector<8x128xf32>, vector<128x128xf32>, vector<8x128xf32> -> vector<8x128xf32>
    %c104 = arith.constant 104 : index
    %c0_80 = arith.constant 0 : index
    %105 = vector.load %arg10[%c104, %c0_80] : memref<128x128xf32, #tpu.memory_space<vmem>>, vector<8x128xf32>
    %106 = arith.addf %104, %105 : vector<8x128xf32>
    %107 = math.tanh %106 : vector<8x128xf32>
    %cst_81 = arith.constant 0.000000e+00 : f32
    %108 = vector.broadcast %cst_81 : f32 to vector<8x128xf32>
    %109 = arith.maximumf %107, %108 : vector<8x128xf32>
    %c104_82 = arith.constant 104 : index
    %c0_83 = arith.constant 0 : index
    %110 = vector.load %arg11[%c104_82, %c0_83] : memref<128x128xf32, #tpu.memory_space<vmem>>, vector<8x128xf32>
    tpu.vector_store %arg11[%c104_82, %c0_83], %109 {strides = array<i32>} : memref<128x128xf32, #tpu.memory_space<vmem>>, vector<8x128xf32>,
    %cst_84 = arith.constant dense<0.000000e+00> : vector<8x128xf32>
    %111 = tpu.matmul %109, %11, %cst_84 {dimension_numbers = #tpu.dot_dimension_numbers<[1], [0], [0], [1], [0, 0, 1, 1], [], []>} : vector<8x128xf32>, vector<128x128xf32>, vector<8x128xf32> -> vector<8x128xf32>
    %c112 = arith.constant 112 : index
    %c0_85 = arith.constant 0 : index
    %112 = vector.load %arg10[%c112, %c0_85] : memref<128x128xf32, #tpu.memory_space<vmem>>, vector<8x128xf32>
    %113 = arith.addf %111, %112 : vector<8x128xf32>
    %114 = math.tanh %113 : vector<8x128xf32>
    %cst_86 = arith.constant 0.000000e+00 : f32
    %115 = vector.broadcast %cst_86 : f32 to vector<8x128xf32>
    %116 = arith.maximumf %114, %115 : vector<8x128xf32>
    %c112_87 = arith.constant 112 : index
    %c0_88 = arith.constant 0 : index
    %117 = vector.load %arg11[%c112_87, %c0_88] : memref<128x128xf32, #tpu.memory_space<vmem>>, vector<8x128xf32>
    tpu.vector_store %arg11[%c112_87, %c0_88], %116 {strides = array<i32>} : memref<128x128xf32, #tpu.memory_space<vmem>>, vector<8x128xf32>,
    %cst_89 = arith.constant dense<0.000000e+00> : vector<8x128xf32>
    %118 = tpu.matmul %116, %11, %cst_89 {dimension_numbers = #tpu.dot_dimension_numbers<[1], [0], [0], [1], [0, 0, 1, 1], [], []>} : vector<8x128xf32>, vector<128x128xf32>, vector<8x128xf32> -> vector<8x128xf32>
    %c120 = arith.constant 120 : index
    %c0_90 = arith.constant 0 : index
    %119 = vector.load %arg10[%c120, %c0_90] : memref<128x128xf32, #tpu.memory_space<vmem>>, vector<8x128xf32>
    %120 = arith.addf %118, %119 : vector<8x128xf32>
    %121 = math.tanh %120 : vector<8x128xf32>
    %cst_91 = arith.constant 0.000000e+00 : f32
    %122 = vector.broadcast %cst_91 : f32 to vector<8x128xf32>
    %123 = arith.maximumf %121, %122 : vector<8x128xf32>
    %c120_92 = arith.constant 120 : index
    %c0_93 = arith.constant 0 : index
    %124 = vector.load %arg11[%c120_92, %c0_93] : memref<128x128xf32, #tpu.memory_space<vmem>>, vector<8x128xf32>
    tpu.vector_store %arg11[%c120_92, %c0_93], %123 {strides = array<i32>} : memref<128x128xf32, #tpu.memory_space<vmem>>, vector<8x128xf32>,
    %c0_94 = arith.constant 0 : index
    %c0_95 = arith.constant 0 : index
    %125 = vector.load %arg12[%c0_94, %c0_95] : memref<8x128xf32, #tpu.memory_space<vmem>>, vector<8x128xf32>
    tpu.vector_store %arg12[%c0_94, %c0_95], %123 {strides = array<i32>} : memref<8x128xf32, #tpu.memory_space<vmem>>, vector<8x128xf32>,
    %c0_96 = arith.constant 0 : index
    %c0_97 = arith.constant 0 : index
    %126 = vector.load %arg11[%c0_96, %c0_97] : memref<128x128xf32, #tpu.memory_space<vmem>>, vector<128x128xf32>
    %c0_98 = arith.constant 0 : index
    %c0_99 = arith.constant 0 : index
    %127 = vector.load %arg6[%c0_98, %c0_99] : memref<128x128xf32, #tpu.memory_space<vmem>>, vector<128x128xf32>
    %cst_100 = arith.constant dense<0.000000e+00> : vector<128x128xf32>
    %128 = tpu.matmul %126, %127, %cst_100 {dimension_numbers = #tpu.dot_dimension_numbers<[1], [0], [0], [1], [0, 0, 1, 1], [], []>} : vector<128x128xf32>, vector<128x128xf32>, vector<128x128xf32> -> vector<128x128xf32>
    %c0_101 = arith.constant 0 : index
    %c0_102 = arith.constant 0 : index
    %129 = vector.load %arg7[%c0_101, %c0_102] : memref<1x128xf32, #tpu.memory_space<vmem>>, vector<1x128xf32>
    %130 = vector.broadcast %129 : vector<1x128xf32> to vector<128x128xf32>
    %131 = arith.addf %128, %130 : vector<128x128xf32>
    %132 = vector.shape_cast %131 : vector<128x128xf32> to vector<16x8x128xf32>
    %c0_103 = arith.constant 0 : index
    %c0_104 = arith.constant 0 : index
    %c0_105 = arith.constant 0 : index
    %133 = vector.load %arg8[%c0_103, %c0_104, %c0_105] : memref<16x8x128xf32, #tpu.memory_space<vmem>>, vector<16x8x128xf32>
    tpu.vector_store %arg8[%c0_103, %c0_104, %c0_105], %132 {strides = array<i32>} : memref<16x8x128xf32, #tpu.memory_space<vmem>>, vector<16x8x128xf32>,
    %c0_i32_106 = arith.constant 0 : i32
    %134 = arith.cmpi eq, %arg0, %c0_i32_106 : i32
    %135 = arith.extui %134 : i1 to i32
    %c0_i32_107 = arith.constant 0 : i32
    %136 = arith.cmpi ne, %135, %c0_i32_107 : i32
    scf.if %136 {
      %c0_108 = arith.constant 0 : index
      %c0_109 = arith.constant 0 : index
      %137 = vector.load %arg9[%c0_108, %c0_109] : memref<8x128xf32, #tpu.memory_space<vmem>>, vector<8x128xf32>
      tpu.vector_store %arg9[%c0_108, %c0_109], %123 {strides = array<i32>} : memref<8x128xf32, #tpu.memory_space<vmem>>, vector<8x128xf32>,
    } else {
    }
    return
  }
  func.func @transform_0(%arg0: i32) -> (i32, i32) {
    %c0_i32 = arith.constant 0 : i32
    %c0_i32_0 = arith.constant 0 : i32
    %c0_i32_1 = arith.constant 0 : i32
    return %c0_i32, %c0_i32_0 : i32, i32
  }
  func.func @transform_1(%arg0: i32) -> (i32, i32, i32) {
    %c0_i32 = arith.constant 0 : i32
    %c0_i32_0 = arith.constant 0 : i32
    %c0_i32_1 = arith.constant 0 : i32
    return %arg0, %c0_i32, %c0_i32_0 : i32, i32, i32
  }
  func.func @transform_2(%arg0: i32) -> (i32, i32) {
    %c0_i32 = arith.constant 0 : i32
    %c0_i32_0 = arith.constant 0 : i32
    %c0_i32_1 = arith.constant 0 : i32
    return %c0_i32, %c0_i32_0 : i32, i32
  }
  func.func @transform_3(%arg0: i32) -> (i32, i32) {
    %c0_i32 = arith.constant 0 : i32
    %c0_i32_0 = arith.constant 0 : i32
    %c0_i32_1 = arith.constant 0 : i32
    return %c0_i32, %c0_i32_0 : i32, i32
  }
  func.func @transform_4(%arg0: i32) -> (i32, i32) {
    %c0_i32 = arith.constant 0 : i32
    %c0_i32_0 = arith.constant 0 : i32
    %c0_i32_1 = arith.constant 0 : i32
    return %c0_i32, %c0_i32_0 : i32, i32
  }
  func.func @transform_5(%arg0: i32) -> (i32, i32) {
    %c0_i32 = arith.constant 0 : i32
    %c0_i32_0 = arith.constant 0 : i32
    %c0_i32_1 = arith.constant 0 : i32
    return %c0_i32, %c0_i32_0 : i32, i32
  }
  func.func @transform_6(%arg0: i32) -> (i32, i32) {
    %c0_i32 = arith.constant 0 : i32
    %c0_i32_0 = arith.constant 0 : i32
    %c0_i32_1 = arith.constant 0 : i32
    return %c0_i32, %c0_i32_0 : i32, i32
  }
  func.func @transform_7(%arg0: i32) -> (i32, i32, i32) {
    %c0_i32 = arith.constant 0 : i32
    %c0_i32_0 = arith.constant 0 : i32
    %c0_i32_1 = arith.constant 0 : i32
    return %arg0, %c0_i32, %c0_i32_0 : i32, i32, i32
  }
  func.func @transform_8(%arg0: i32) -> (i32, i32) {
    %c0_i32 = arith.constant 0 : i32
    %c0_i32_0 = arith.constant 0 : i32
    %c0_i32_1 = arith.constant 0 : i32
    return %c0_i32, %c0_i32_0 : i32, i32
  }
}

</mosaic_0001>

<bundles_post_ra>
// kernel: stim_model_rollout.1
= control target key start
LH: loop header
LB: loop body
LE: loop exit
PB: predicated region body
PF: predicated region fallthrough
CT: control target
= control target key end

     0   :  { %s1474_s3 = inlined_call_operand.vmem [shape: f32[128,128], index: 3, kind: input, shape index: {}]   ;;  %s1475_s2 = inlined_call_operand.vmem [shape: f32[128,128], index: 2, kind: input, shape index: {}]   ;;  %s1476_s4 = inlined_call_operand.vmem [shape: f32[1,128], index: 4, kind: input, shape index: {}]   ;;  %s1477_s1 = inlined_call_operand.vmem [shape: f32[16,8,128], index: 1, kind: input, shape index: {}]   ;;  %s1478_s0 = inlined_call_operand.vmem [shape: f32[8,128], index: 0, kind: input, shape index: {}]   ;;  %s1479_s5 = inlined_call_operand.vmem [shape: f32[128,128], index: 5, kind: input, shape index: {}]   ;;  %s1480_s6 = inlined_call_operand.vmem [shape: f32[1,128], index: 6, kind: input, shape index: {}]   ;;  %s1481_s7 = inlined_call_operand.vmem [shape: f32[16,8,128], index: 7, kind: output, shape index: {0}]   ;;  %s1482_s8 = inlined_call_operand.vmem [shape: f32[8,128], index: 8, kind: output, shape index: {1}]  }
   0x1   :  { %v65_v0 = vld [vmem:[%s1474_s3 + $0x78] sm:$0xff]  ;;  %v64_v1 = vld [vmem:[%s1474_s3 + $0x70] sm:$0xff]  ;;  %v63_v2 = vld [vmem:[%s1474_s3 + $0x68] sm:$0xff] }
   0x2   :  { %70 = vmatpush.msra.mxu1 %v65_v0  ;;  %682 = vmatpush.msra.mxu2 %v65_v0  ;;  %v62_v3 = vld [vmem:[%s1474_s3 + $0x60] sm:$0xff]  ;;  %v808_v4 = vld [vmem:[%s1475_s2 + $0x78] sm:$0xff]  ;;  %v817_v6 = vld [vmem:[%s1475_s2 + $0x70] sm:$0xff] }
   0x3   :  { %683 = vmatpush.msra.mxu3 %v65_v0  ;;  %v61_v5 = vld [vmem:[%s1474_s3 + $0x58] sm:$0xff]  ;;  %457 = vmatpush.msra.mxu0 %v808_v4  ;;  %v60_v7 = vld [vmem:[%s1474_s3 + $0x50] sm:$0xff]  ;;  %v826_v8 = vld [vmem:[%s1475_s2 + $0x68] sm:$0xff] }
   0x4   :  { %71 = vmatpush.msra.mxu1 %v64_v1  ;;  %684 = vmatpush.msra.mxu2 %v64_v1  ;;  %v59_v9 = vld [vmem:[%s1474_s3 + $0x48] sm:$0xff]  ;;  %v835_v10 = vld [vmem:[%s1475_s2 + $0x60] sm:$0xff]  ;;  %v844_v12 = vld [vmem:[%s1475_s2 + $0x58] sm:$0xff] }
   0x5   :  { %685 = vmatpush.msra.mxu3 %v64_v1  ;;  %458 = vmatpush.msra.mxu0 %v817_v6  ;;  %v58_v11 = vld [vmem:[%s1474_s3 + $0x40] sm:$0xff]  ;;  %v57_v13 = vld [vmem:[%s1474_s3 + $0x38] sm:$0xff]  ;;  %v853_v14 = vld [vmem:[%s1475_s2 + $0x50] sm:$0xff] }
   0x6   :  { %72 = vmatpush.msra.mxu1 %v63_v2  ;;  %686 = vmatpush.msra.mxu2 %v63_v2  ;;  %v56_v15 = vld [vmem:[%s1474_s3 + $0x30] sm:$0xff]  ;;  %v862_v16 = vld [vmem:[%s1475_s2 + $0x48] sm:$0xff]  ;;  %v871_v18 = vld [vmem:[%s1475_s2 + $0x40] sm:$0xff] }
   0x7   :  { %687 = vmatpush.msra.mxu3 %v63_v2  ;;  %459 = vmatpush.msra.mxu0 %v826_v8  ;;  %v55_v17 = vld [vmem:[%s1474_s3 + $0x28] sm:$0xff]  ;;  %v54_v19 = vld [vmem:[%s1474_s3 + $0x20] sm:$0xff]  ;;  %v880_v20 = vld [vmem:[%s1475_s2 + $0x38] sm:$0xff] }
   0x8   :  { %73 = vmatpush.msra.mxu1 %v62_v3  ;;  %688 = vmatpush.msra.mxu2 %v62_v3  ;;  %v53_v21 = vld [vmem:[%s1474_s3 + $0x18] sm:$0xff]  ;;  %v889_v22 = vld [vmem:[%s1475_s2 + $0x30] sm:$0xff]  ;;  %v898_v24 = vld [vmem:[%s1475_s2 + $0x28] sm:$0xff] }
   0x9   :  { %689 = vmatpush.msra.mxu3 %v62_v3  ;;  %460 = vmatpush.msra.mxu0 %v835_v10  ;;  %v52_v23 = vld [vmem:[%s1474_s3 + $0x10] sm:$0xff]  ;;  %v51_v25 = vld [vmem:[%s1474_s3 + $0x8] sm:$0xff]  ;;  %v907_v26 = vld [vmem:[%s1475_s2 + $0x20] sm:$0xff] }
   0xa   :  { %74 = vmatpush.msra.mxu1 %v61_v5  ;;  %690 = vmatpush.msra.mxu2 %v61_v5  ;;  %v50_v27 = vld [vmem:[%s1474_s3] sm:$0xff]  ;;  %v919_v29 = vld [vmem:[%s1475_s2 + $0x18] sm:$0xff]  ;;  %v927_v30 = vld [vmem:[%s1475_s2 + $0x10] sm:$0xff] }
   0xb   :  { %691 = vmatpush.msra.mxu3 %v61_v5  ;;  %461 = vmatpush.msra.mxu0 %v844_v12  ;;  %v34_v28 = vld [vmem:[%s1477_s1] sm:$0xff]  ;;  %v936_v31 = vld [vmem:[%s1475_s2 + $0x8] sm:$0xff]  ;;  %v36_v35 = vld [vmem:[%s1477_s1 + $0x10] sm:$0xff] }
   0xc   :  { %75 = vmatpush.msra.mxu1 %v60_v7  ;;  %692 = vmatpush.msra.mxu2 %v60_v7  ;;  %v35_v32 = vld [vmem:[%s1477_s1 + $0x8] sm:$0xff]  ;;  %v948_v33 = vld [vmem:[%s1475_s2] sm:$0xff]  ;;  %v37_v36 = vld [vmem:[%s1477_s1 + $0x18] sm:$0xff] }
   0xd   :  { %693 = vmatpush.msra.mxu3 %v60_v7  ;;  %462 = vmatpush.msra.mxu0 %v853_v14  ;;  %v39_v34 = vld [vmem:[%s1477_s1 + $0x28] sm:$0xff]  ;;  %v38_v37 = vld [vmem:[%s1477_s1 + $0x20] sm:$0xff]  ;;  %v40_v39 = vld [vmem:[%s1477_s1 + $0x30] sm:$0xff] }
   0xe   :  { %76 = vmatpush.msra.mxu1 %v59_v9  ;;  %694 = vmatpush.msra.mxu2 %v59_v9  ;;  %v32_v38 = vld [vmem:[%s1478_s0] sm:$0xff]  ;;  %v41_v40 = vld [vmem:[%s1477_s1 + $0x38] sm:$0xff]  ;;  %v43_v42 = vld [vmem:[%s1477_s1 + $0x48] sm:$0xff] }
   0xf   :  { %695 = vmatpush.msra.mxu3 %v59_v9  ;;  %463 = vmatpush.msra.mxu0 %v862_v16  ;;  %v42_v41 = vld [vmem:[%s1477_s1 + $0x40] sm:$0xff]  ;;  %v44_v44 = vld [vmem:[%s1477_s1 + $0x50] sm:$0xff]  ;;  %v45_v46 = vld [vmem:[%s1477_s1 + $0x58] sm:$0xff] }
  0x10   :  { %77 = vmatpush.msra.mxu1 %v58_v11  ;;  %696 = vmatpush.msra.mxu2 %v58_v11  ;;  %v1081_v50 = vld [vmem:[%s1476_s4] ss:$0 sm:$0xff]  ;;  %v47_v57 = vld [vmem:[%s1477_s1 + $0x68] sm:$0xff]  ;;  %v48_v58 = vld [vmem:[%s1477_s1 + $0x70] sm:$0xff] }
  0x11   :  { %697 = vmatpush.msra.mxu3 %v58_v11  ;;  %464 = vmatpush.msra.mxu0 %v871_v18  ;;  %v46_v56 = vld [vmem:[%s1477_s1 + $0x60] sm:$0xff]  ;;  %v49_v0 = vld [vmem:[%s1477_s1 + $0x78] sm:$0xff] }
  0x12   :  { %78 = vmatpush.msra.mxu1 %v57_v13  ;;  %698 = vmatpush.msra.mxu2 %v57_v13 }
  0x13   :  { %699 = vmatpush.msra.mxu3 %v57_v13  ;;  %465 = vmatpush.msra.mxu0 %v880_v20 }
  0x14   :  { %79 = vmatpush.msra.mxu1 %v56_v15  ;;  %700 = vmatpush.msra.mxu2 %v56_v15 }
  0x15   :  { %701 = vmatpush.msra.mxu3 %v56_v15  ;;  %466 = vmatpush.msra.mxu0 %v889_v22 }
  0x16   :  { %80 = vmatpush.msra.mxu1 %v55_v17  ;;  %702 = vmatpush.msra.mxu2 %v55_v17 }
  0x17   :  { %703 = vmatpush.msra.mxu3 %v55_v17  ;;  %467 = vmatpush.msra.mxu0 %v898_v24 }
  0x18   :  { %81 = vmatpush.msra.mxu1 %v54_v19  ;;  %704 = vmatpush.msra.mxu2 %v54_v19 }
  0x19   :  { %705 = vmatpush.msra.mxu3 %v54_v19  ;;  %468 = vmatpush.msra.mxu0 %v907_v26 }
  0x1a   :  { %82 = vmatpush.msra.mxu1 %v53_v21  ;;  %706 = vmatpush.msra.mxu2 %v53_v21 }
  0x1b   :  { %707 = vmatpush.msra.mxu3 %v53_v21  ;;  %469 = vmatpush.msra.mxu0 %v919_v29 }
  0x1c   :  { %83 = vmatpush.msra.mxu1 %v52_v23  ;;  %708 = vmatpush.msra.mxu2 %v52_v23 }
  0x1d   :  { %709 = vmatpush.msra.mxu3 %v52_v23  ;;  %470 = vmatpush.msra.mxu0 %v927_v30 }
  0x1e   :  { %84 = vmatpush.msra.mxu1 %v51_v25  ;;  %710 = vmatpush.msra.mxu2 %v51_v25 }
  0x1f   :  { %711 = vmatpush.msra.mxu3 %v51_v25  ;;  %471 = vmatpush.msra.mxu0 %v936_v31 }
  0x20   :  { %85 = vmatpush.msra.mxu1 %v50_v27  ;;  %712 = vmatpush.msra.mxu2 %v50_v27 }
  0x21   :  { %86 = vmatmul.f32.vlgmr.msra.gmra.mxu1 %v34_v28  ;;  %713 = vmatpush.msra.mxu3 %v50_v27 }
  0x22   :  { %193 = vmatpush.msrb.mxu2 %v808_v4  ;;  %169 = vmatpush.msrb.mxu1 %v808_v4 }
  0x23   :  { %217 = vmatpush.msrb.mxu3 %v808_v4  ;;  %472 = vmatpush.msra.mxu0 %v948_v33 }
  0x24   :  { %194 = vmatpush.msrb.mxu2 %v817_v6  ;;  %170 = vmatpush.msrb.mxu1 %v817_v6 }
  0x25   :  { %218 = vmatpush.msrb.mxu3 %v817_v6  ;;  %101 = vmatmul.f32.vlgmr.msra.gmra.mxu2 %v39_v34 }
  0x26   :  { %195 = vmatpush.msrb.mxu2 %v826_v8  ;;  %171 = vmatpush.msrb.mxu1 %v826_v8 }
  0x27   :  { %219 = vmatpush.msrb.mxu3 %v826_v8 }
  0x28   :  { %196 = vmatpush.msrb.mxu2 %v835_v10  ;;  %172 = vmatpush.msrb.mxu1 %v835_v10 }
  0x29   :  { %89 = vmatmul.f32.gmra.mxu1 %v35_v32  ;;  %220 = vmatpush.msrb.mxu3 %v835_v10 }
  0x2a   :  { %197 = vmatpush.msrb.mxu2 %v844_v12  ;;  %173 = vmatpush.msrb.mxu1 %v844_v12 }
  0x2b   :  { %221 = vmatpush.msrb.mxu3 %v844_v12 }
  0x2c   :  { %198 = vmatpush.msrb.mxu2 %v853_v14  ;;  %174 = vmatpush.msrb.mxu1 %v853_v14 }
  0x2d   :  { %222 = vmatpush.msrb.mxu3 %v853_v14  ;;  %104 = vmatmul.f32.gmra.mxu2 %v40_v39 }
  0x2e   :  { %199 = vmatpush.msrb.mxu2 %v862_v16  ;;  %175 = vmatpush.msrb.mxu1 %v862_v16 }
  0x2f   :  { %223 = vmatpush.msrb.mxu3 %v862_v16 }
  0x30   :  { %200 = vmatpush.msrb.mxu2 %v871_v18  ;;  %176 = vmatpush.msrb.mxu1 %v871_v18 }
  0x31   :  { %92 = vmatmul.f32.gmra.mxu1 %v36_v35  ;;  %224 = vmatpush.msrb.mxu3 %v871_v18 }
  0x32   :  { %201 = vmatpush.msrb.mxu2 %v880_v20  ;;  %177 = vmatpush.msrb.mxu1 %v880_v20 }
  0x33   :  { %225 = vmatpush.msrb.mxu3 %v880_v20 }
  0x34   :  { %202 = vmatpush.msrb.mxu2 %v889_v22  ;;  %178 = vmatpush.msrb.mxu1 %v889_v22 }
  0x35   :  { %226 = vmatpush.msrb.mxu3 %v889_v22  ;;  %107 = vmatmul.f32.gmra.mxu2 %v41_v40 }
  0x36   :  { %203 = vmatpush.msrb.mxu2 %v898_v24  ;;  %179 = vmatpush.msrb.mxu1 %v898_v24 }
  0x37   :  { %227 = vmatpush.msrb.mxu3 %v898_v24 }
  0x38   :  { %204 = vmatpush.msrb.mxu2 %v907_v26  ;;  %180 = vmatpush.msrb.mxu1 %v907_v26 }
  0x39   :  { %95 = vmatmul.f32.gmra.mxu1 %v37_v36  ;;  %228 = vmatpush.msrb.mxu3 %v907_v26 }
  0x3a   :  { %205 = vmatpush.msrb.mxu2 %v919_v29  ;;  %181 = vmatpush.msrb.mxu1 %v919_v29 }
  0x3b   :  { %229 = vmatpush.msrb.mxu3 %v919_v29 }
  0x3c   :  { %206 = vmatpush.msrb.mxu2 %v927_v30  ;;  %182 = vmatpush.msrb.mxu1 %v927_v30 }
  0x3d   :  { %230 = vmatpush.msrb.mxu3 %v927_v30  ;;  %110 = vmatmul.f32.gmra.mxu2 %v42_v41 }
  0x3e   :  { %207 = vmatpush.msrb.mxu2 %v936_v31  ;;  %183 = vmatpush.msrb.mxu1 %v936_v31 }
  0x3f   :  { %231 = vmatpush.msrb.mxu3 %v936_v31 }
  0x40   :  { %208 = vmatpush.msrb.mxu2 %v948_v33  ;;  %184 = vmatpush.msrb.mxu1 %v948_v33 }
  0x41   :  { %98 = vmatmul.f32.gmra.mxu1 %v38_v37  ;;  %232 = vmatpush.msrb.mxu3 %v948_v33 }
  0x42   :  { %265 = vmatpush.msra.mxu2 %v808_v4  ;;  %241 = vmatpush.msra.mxu1 %v808_v4 }
  0x43   :  { %122 = vmatmul.f32.vlgmr.msra.gmra.mxu3 %v46_v56 }
  0x44   :  { %266 = vmatpush.msra.mxu2 %v817_v6  ;;  %242 = vmatpush.msra.mxu1 %v817_v6 }
  0x45   :  { %113 = vmatmul.f32.gmra.mxu2 %v43_v42  ;;  %289 = vmatpush.msra.mxu3 %v808_v4 }
  0x46   :  { %267 = vmatpush.msra.mxu2 %v826_v8  ;;  %243 = vmatpush.msra.mxu1 %v826_v8 }
  0x47   :  { %290 = vmatpush.msra.mxu3 %v817_v6 }
  0x48   :  { %268 = vmatpush.msra.mxu2 %v835_v10  ;;  %244 = vmatpush.msra.mxu1 %v835_v10 }
  0x49   :  { %185 = vmatmul.f32.vlgmr.msrb.gmra.mxu1 %v32_v38  ;;  %291 = vmatpush.msra.mxu3 %v826_v8 }
  0x4a   :  { %269 = vmatpush.msra.mxu2 %v844_v12  ;;  %245 = vmatpush.msra.mxu1 %v844_v12 }
  0x4b   :  { %292 = vmatpush.msra.mxu3 %v835_v10 }
  0x4c   :  { %270 = vmatpush.msra.mxu2 %v853_v14  ;;  %246 = vmatpush.msra.mxu1 %v853_v14 }
  0x4d   :  { %116 = vmatmul.f32.gmra.mxu2 %v44_v44  ;;  %125 = vmatmul.f32.gmra.mxu3 %v47_v57 }
  0x4e   :  { %271 = vmatpush.msra.mxu2 %v862_v16  ;;  %247 = vmatpush.msra.mxu1 %v862_v16 }
  0x4f   :  { %293 = vmatpush.msra.mxu3 %v844_v12 }
  0x50   :  { %272 = vmatpush.msra.mxu2 %v871_v18  ;;  %248 = vmatpush.msra.mxu1 %v871_v18 }
  0x51   :  { %294 = vmatpush.msra.mxu3 %v853_v14 }
  0x52   :  { %273 = vmatpush.msra.mxu2 %v880_v20  ;;  %249 = vmatpush.msra.mxu1 %v880_v20 }
  0x53   :  { %295 = vmatpush.msra.mxu3 %v862_v16 }
  0x54   :  { %274 = vmatpush.msra.mxu2 %v889_v22  ;;  %250 = vmatpush.msra.mxu1 %v889_v22 }
  0x55   :  { %119 = vmatmul.f32.gmra.mxu2 %v45_v46  ;;  %296 = vmatpush.msra.mxu3 %v871_v18 }
  0x56   :  { %275 = vmatpush.msra.mxu2 %v898_v24  ;;  %251 = vmatpush.msra.mxu1 %v898_v24 }
  0x57   :  { %297 = vmatpush.msra.mxu3 %v880_v20 }
  0x58   :  { %276 = vmatpush.msra.mxu2 %v907_v26  ;;  %252 = vmatpush.msra.mxu1 %v907_v26 }
  0x59   :  { %128 = vmatmul.f32.gmra.mxu3 %v48_v58 }
  0x5a   :  { %277 = vmatpush.msra.mxu2 %v919_v29  ;;  %253 = vmatpush.msra.mxu1 %v919_v29 }
  0x5b   :  { %298 = vmatpush.msra.mxu3 %v889_v22 }
  0x5c   :  { %278 = vmatpush.msra.mxu2 %v927_v30  ;;  %254 = vmatpush.msra.mxu1 %v927_v30 }
  0x5d   :  { %299 = vmatpush.msra.mxu3 %v898_v24 }
  0x5e   :  { %279 = vmatpush.msra.mxu2 %v936_v31  ;;  %255 = vmatpush.msra.mxu1 %v936_v31 }
  0x5f   :  { %300 = vmatpush.msra.mxu3 %v907_v26 }
  0x60   :  { %280 = vmatpush.msra.mxu2 %v948_v33  ;;  %256 = vmatpush.msra.mxu1 %v948_v33 }
  0x61   :  { %301 = vmatpush.msra.mxu3 %v919_v29 }
  0x62   :  { %313 = vmatpush.msrb.mxu1 %v808_v4  ;;  %131 = vmatmul.f32.gmra.mxu3 %v49_v0 }
  0x63   :  { %302 = vmatpush.msra.mxu3 %v927_v30 }
  0x64   :  { %314 = vmatpush.msrb.mxu1 %v817_v6 }
  0x65   :  { %303 = vmatpush.msra.mxu3 %v936_v31 }
  0x66   :  { %315 = vmatpush.msrb.mxu1 %v826_v8 }
  0x67   :  { %304 = vmatpush.msra.mxu3 %v948_v33 }
  0x68   :  { %316 = vmatpush.msrb.mxu1 %v835_v10 }
  0x6a   :  { %317 = vmatpush.msrb.mxu1 %v844_v12 }
  0x6c   :  { %318 = vmatpush.msrb.mxu1 %v853_v14 }
  0x6e   :  { %319 = vmatpush.msrb.mxu1 %v862_v16 }
  0x70   :  { %320 = vmatpush.msrb.mxu1 %v871_v18 }
  0x72   :  { %321 = vmatpush.msrb.mxu1 %v880_v20 }
  0x74   :  { %322 = vmatpush.msrb.mxu1 %v889_v22 }
  0x76   :  { %323 = vmatpush.msrb.mxu1 %v898_v24 }
  0x78   :  { %324 = vmatpush.msrb.mxu1 %v907_v26 }
  0x7a   :  { %325 = vmatpush.msrb.mxu1 %v919_v29 }
  0x7c   :  { %326 = vmatpush.msrb.mxu1 %v927_v30 }
  0x7e   :  { %327 = vmatpush.msrb.mxu1 %v936_v31 }
  0x80   :  { %328 = vmatpush.msrb.mxu1 %v948_v33 }
  0x9e   :  { %v87_v43 = vpop.f32.mrf.mxu1 }
  0x9f   :  { %v88_v51 = vadd.f32 %v1081_v50, %v87_v43 }
  0xa6   :  { %v90_v45 = vpop.f32.mrf.mxu1 }
  0xa7   :  { %v91_v3 = vadd.f32 %v1081_v50, %v90_v45 }
  0xa8   :  { %v1123_v59 = vpop.f32.mrf.mxu2 }
  0xa9   :  { %v103_v43 = vadd.f32 %v1081_v50, %v1123_v59 }
  0xae   :  { %v1072_v47 = vpop.f32.mrf.mxu1 }
  0xaf   :  { %v94_v21 = vadd.f32 %v1081_v50, %v1072_v47 }
  0xb0   :  { %v1130_v60 = vpop.f32.mrf.mxu2 }
  0xb6   :  { %v1074_v48 = vpop.f32.mrf.mxu1 }
  0xb7   :  { %v97_v32 = vadd.f32 %v1081_v50, %v1074_v48  ;;  %v106_v48 = vadd.f32 %v1081_v50, %v1130_v60 }
  0xb8   :  { %v1134_v61 = vpop.f32.mrf.mxu2 }
  0xb9   :  { %v109_v56 = vadd.f32 %v1081_v50, %v1134_v61 }
  0xbe   :  { %v1076_v49 = vpop.f32.mrf.mxu1 }
  0xbf   :  { %v100_v38 = vadd.f32 %v1081_v50, %v1076_v49 }
  0xc0   :  { %v1136_v62 = vpop.f32.mrf.mxu2 }
  0xc6   :  { %v186_v52 = vpop.f32.mrf.mxu1  ;;  %v1169_v13 = vpop.f32.mrf.mxu3 }
  0xc7   :  { %v187_v53 = vadd.f32 %v186_v52, %v88_v51 }
  0xc8   :  { %v1138_v63 = vpop.f32.mrf.mxu2 }
  0xc9   :  { %716 = vtanh.f32 %v187_v53 }
  0xcf   :  { %v1084_v54 = vpop.eup %716 }
  0xd0   :  { %v190_v55 = vmax.f32 %v1084_v54, 0.0  ;;  %v1143_v1 = vpop.f32.mrf.mxu2  ;;  %v1171_v15 = vpop.f32.mrf.mxu3  ;;  %v124_v54 = vadd.f32 %v1081_v50, %v1169_v13 }
  0xd1   :  { %v118_v61 = vadd.f32 %v1081_v50, %v1143_v1  ;;  %v576_v1 = vld [vmem:[%s1479_s5 + $0x38] sm:$0xff] }
  0xd2   :  { %209 = vmatmul.f32.vlgmr.msrb.gmra.mxu2 %v190_v55 }
  0xd3   :  { %337 = vmatpush.msrb.mxu2 %v808_v4 }
  0xd5   :  { %338 = vmatpush.msrb.mxu2 %v817_v6 }
  0xd7   :  { %339 = vmatpush.msrb.mxu2 %v826_v8 }
  0xd8   :  { %v1145_v2 = vpop.f32.mrf.mxu2 }
  0xd9   :  { %340 = vmatpush.msrb.mxu2 %v835_v10 }
  0xdb   :  { %341 = vmatpush.msrb.mxu2 %v844_v12 }
  0xdc   :  { %v1173_v17 = vpop.f32.mrf.mxu3 }
  0xdd   :  { %342 = vmatpush.msrb.mxu2 %v853_v14 }
  0xdf   :  { %343 = vmatpush.msrb.mxu2 %v862_v16 }
  0xe1   :  { %344 = vmatpush.msrb.mxu2 %v871_v18 }
  0xe3   :  { %345 = vmatpush.msrb.mxu2 %v880_v20 }
  0xe5   :  { %346 = vmatpush.msrb.mxu2 %v889_v22  ;;  %v1175_v19 = vpop.f32.mrf.mxu3 }
  0xe7   :  { %347 = vmatpush.msrb.mxu2 %v898_v24 }
  0xe9   :  { %348 = vmatpush.msrb.mxu2 %v907_v26 }
  0xeb   :  { %349 = vmatpush.msrb.mxu2 %v919_v29 }
  0xed   :  { %350 = vmatpush.msrb.mxu2 %v927_v30 }
  0xef   :  { %351 = vmatpush.msrb.mxu2 %v936_v31 }
  0xf1   :  { %352 = vmatpush.msrb.mxu2 %v948_v33 }
 0x155   :  { %v210_v5 = vpop.f32.mrf.mxu2 }
 0x156   :  { %v211_v7 = vadd.f32 %v210_v5, %v91_v3  ;;  %v578_v5 = vld [vmem:[%s1479_s5 + $0x48] sm:$0xff] }
 0x158   :  { %718 = vtanh.f32 %v211_v7  ;;  %v577_v7 = vld [vmem:[%s1479_s5 + $0x40] sm:$0xff] }
 0x15e   :  { %v1148_v9 = vpop.eup %718 }
 0x15f   :  { %v214_v11 = vmax.f32 %v1148_v9, 0.0  ;;  %v1399_v9 = vld [vmem:[%s1480_s6] ss:$0 sm:$0xff] }
 0x161   :  { %233 = vmatmul.f32.vlgmr.msrb.gmra.mxu3 %v214_v11 }
 0x162   :  { %361 = vmatpush.msrb.mxu3 %v808_v4 }
 0x164   :  { %362 = vmatpush.msrb.mxu3 %v817_v6 }
 0x166   :  { %363 = vmatpush.msrb.mxu3 %v826_v8 }
 0x168   :  { %364 = vmatpush.msrb.mxu3 %v835_v10 }
 0x16a   :  { %365 = vmatpush.msrb.mxu3 %v844_v12 }
 0x16c   :  { %366 = vmatpush.msrb.mxu3 %v853_v14 }
 0x16e   :  { %367 = vmatpush.msrb.mxu3 %v862_v16 }
 0x170   :  { %368 = vmatpush.msrb.mxu3 %v871_v18 }
 0x172   :  { %369 = vmatpush.msrb.mxu3 %v880_v20 }
 0x174   :  { %370 = vmatpush.msrb.mxu3 %v889_v22 }
 0x176   :  { %371 = vmatpush.msrb.mxu3 %v898_v24 }
 0x178   :  { %372 = vmatpush.msrb.mxu3 %v907_v26 }
 0x17a   :  { %373 = vmatpush.msrb.mxu3 %v919_v29 }
 0x17c   :  { %374 = vmatpush.msrb.mxu3 %v927_v30 }
 0x17e   :  { %375 = vmatpush.msrb.mxu3 %v936_v31 }
 0x180   :  { %376 = vmatpush.msrb.mxu3 %v948_v33 }
 0x1e4   :  { %v234_v23 = vpop.f32.mrf.mxu3 }
 0x1e5   :  { %v235_v25 = vadd.f32 %v234_v23, %v94_v21  ;;  %v575_v21 = vld [vmem:[%s1479_s5 + $0x30] sm:$0xff]  ;;  %v574_v23 = vld [vmem:[%s1479_s5 + $0x28] sm:$0xff] }
 0x1e7   :  { %720 = vtanh.f32 %v235_v25  ;;  %v573_v25 = vld [vmem:[%s1479_s5 + $0x20] sm:$0xff] }
 0x1ed   :  { %v1179_v27 = vpop.eup %720 }
 0x1ee   :  { %v238_v28 = vmax.f32 %v1179_v27, 0.0 }
 0x1f0   :  { %257 = vmatmul.f32.vlgmr.msra.gmra.mxu1 %v238_v28 }
 0x1f1   :  { %385 = vmatpush.msra.mxu1 %v808_v4 }
 0x1f3   :  { %386 = vmatpush.msra.mxu1 %v817_v6 }
 0x1f5   :  { %387 = vmatpush.msra.mxu1 %v826_v8 }
 0x1f7   :  { %388 = vmatpush.msra.mxu1 %v835_v10 }
 0x1f9   :  { %389 = vmatpush.msra.mxu1 %v844_v12 }
 0x1fb   :  { %390 = vmatpush.msra.mxu1 %v853_v14 }
 0x1fd   :  { %391 = vmatpush.msra.mxu1 %v862_v16 }
 0x1ff   :  { %392 = vmatpush.msra.mxu1 %v871_v18 }
 0x201   :  { %393 = vmatpush.msra.mxu1 %v880_v20 }
 0x203   :  { %394 = vmatpush.msra.mxu1 %v889_v22 }
 0x205   :  { %395 = vmatpush.msra.mxu1 %v898_v24 }
 0x207   :  { %396 = vmatpush.msra.mxu1 %v907_v26 }
 0x209   :  { %397 = vmatpush.msra.mxu1 %v919_v29 }
 0x20b   :  { %398 = vmatpush.msra.mxu1 %v927_v30 }
 0x20d   :  { %399 = vmatpush.msra.mxu1 %v936_v31 }
 0x20f   :  { %400 = vmatpush.msra.mxu1 %v948_v33 }
 0x26d   :  { %v258_v34 = vpop.f32.mrf.mxu1 }
 0x26e   :  { %v259_v35 = vadd.f32 %v258_v34, %v97_v32  ;;  %v572_v32 = vld [vmem:[%s1479_s5 + $0x18] sm:$0xff]  ;;  %v571_v34 = vld [vmem:[%s1479_s5 + $0x10] sm:$0xff] }
 0x270   :  { %722 = vtanh.f32 %v259_v35  ;;  %v570_v35 = vld [vmem:[%s1479_s5 + $0x8] sm:$0xff] }
 0x276   :  { %v1202_v36 = vpop.eup %722 }
 0x277   :  { %v262_v37 = vmax.f32 %v1202_v36, 0.0 }
 0x279   :  { %281 = vmatmul.f32.vlgmr.msra.gmra.mxu2 %v262_v37 }
 0x27a   :  { %409 = vmatpush.msra.mxu2 %v808_v4 }
 0x27c   :  { %410 = vmatpush.msra.mxu2 %v817_v6 }
 0x27e   :  { %411 = vmatpush.msra.mxu2 %v826_v8 }
 0x280   :  { %412 = vmatpush.msra.mxu2 %v835_v10 }
 0x282   :  { %413 = vmatpush.msra.mxu2 %v844_v12 }
 0x284   :  { %414 = vmatpush.msra.mxu2 %v853_v14 }
 0x286   :  { %415 = vmatpush.msra.mxu2 %v862_v16 }
 0x288   :  { %416 = vmatpush.msra.mxu2 %v871_v18 }
 0x28a   :  { %417 = vmatpush.msra.mxu2 %v880_v20 }
 0x28c   :  { %418 = vmatpush.msra.mxu2 %v889_v22 }
 0x28e   :  { %419 = vmatpush.msra.mxu2 %v898_v24 }
 0x290   :  { %420 = vmatpush.msra.mxu2 %v907_v26 }
 0x292   :  { %421 = vmatpush.msra.mxu2 %v919_v29 }
 0x294   :  { %422 = vmatpush.msra.mxu2 %v927_v30 }
 0x296   :  { %423 = vmatpush.msra.mxu2 %v936_v31 }
 0x298   :  { %424 = vmatpush.msra.mxu2 %v948_v33 }
 0x2fc   :  { %v282_v39 = vpop.f32.mrf.mxu2 }
 0x2fd   :  { %v283_v40 = vadd.f32 %v282_v39, %v100_v38  ;;  %v569_v38 = vld [vmem:[%s1479_s5] sm:$0xff]  ;;  %v121_v39 = vadd.f32 %v1081_v50, %v1145_v2 }
 0x2ff   :  { %724 = vtanh.f32 %v283_v40 }
 0x305   :  { %v1225_v41 = vpop.eup %724 }
 0x306   :  { %v286_v42 = vmax.f32 %v1225_v41, 0.0 }
 0x308   :  { %305 = vmatmul.f32.vlgmr.msra.gmra.mxu3 %v286_v42 }
 0x309   :  { %433 = vmatpush.msra.mxu3 %v808_v4 }
 0x30b   :  { %434 = vmatpush.msra.mxu3 %v817_v6 }
 0x30d   :  { %435 = vmatpush.msra.mxu3 %v826_v8 }
 0x30f   :  { %436 = vmatpush.msra.mxu3 %v835_v10 }
 0x311   :  { %437 = vmatpush.msra.mxu3 %v844_v12 }
 0x313   :  { %438 = vmatpush.msra.mxu3 %v853_v14 }
 0x315   :  { %439 = vmatpush.msra.mxu3 %v862_v16 }
 0x317   :  { %440 = vmatpush.msra.mxu3 %v871_v18 }
 0x319   :  { %441 = vmatpush.msra.mxu3 %v880_v20 }
 0x31b   :  { %442 = vmatpush.msra.mxu3 %v889_v22 }
 0x31d   :  { %443 = vmatpush.msra.mxu3 %v898_v24 }
 0x31f   :  { %444 = vmatpush.msra.mxu3 %v907_v26 }
 0x321   :  { %445 = vmatpush.msra.mxu3 %v919_v29 }
 0x323   :  { %446 = vmatpush.msra.mxu3 %v927_v30 }
 0x325   :  { %447 = vmatpush.msra.mxu3 %v936_v31 }
 0x327   :  { %448 = vmatpush.msra.mxu3 %v948_v33 }
 0x38b   :  { %v306_v44 = vpop.f32.mrf.mxu3 }
 0x38c   :  { %v307_v45 = vadd.f32 %v306_v44, %v103_v43 }
 0x38e   :  { %726 = vtanh.f32 %v307_v45 }
 0x394   :  { %v1248_v46 = vpop.eup %726 }
 0x395   :  { %v310_v47 = vmax.f32 %v1248_v46, 0.0 }
 0x397   :  { %329 = vmatmul.f32.vlgmr.msrb.gmra.mxu1 %v310_v47 }
 0x398   :  { %481 = vmatpush.msrb.mxu1 %v808_v4 }
 0x39a   :  { %482 = vmatpush.msrb.mxu1 %v817_v6 }
 0x39c   :  { %483 = vmatpush.msrb.mxu1 %v826_v8 }
 0x39e   :  { %484 = vmatpush.msrb.mxu1 %v835_v10 }
 0x3a0   :  { %485 = vmatpush.msrb.mxu1 %v844_v12 }
 0x3a2   :  { %486 = vmatpush.msrb.mxu1 %v853_v14 }
 0x3a4   :  { %487 = vmatpush.msrb.mxu1 %v862_v16 }
 0x3a6   :  { %488 = vmatpush.msrb.mxu1 %v871_v18 }
 0x3a8   :  { %489 = vmatpush.msrb.mxu1 %v880_v20 }
 0x3aa   :  { %490 = vmatpush.msrb.mxu1 %v889_v22 }
 0x3ac   :  { %491 = vmatpush.msrb.mxu1 %v898_v24 }
 0x3ae   :  { %492 = vmatpush.msrb.mxu1 %v907_v26 }
 0x3b0   :  { %493 = vmatpush.msrb.mxu1 %v919_v29 }
 0x3b2   :  { %494 = vmatpush.msrb.mxu1 %v927_v30 }
 0x3b4   :  { %495 = vmatpush.msrb.mxu1 %v936_v31 }
 0x3b6   :  { %496 = vmatpush.msrb.mxu1 %v948_v33 }
 0x414   :  { %v330_v49 = vpop.f32.mrf.mxu1 }
 0x415   :  { %v331_v51 = vadd.f32 %v330_v49, %v106_v48 }
 0x417   :  { %728 = vtanh.f32 %v331_v51 }
 0x41d   :  { %v1271_v52 = vpop.eup %728 }
 0x41e   :  { %v334_v53 = vmax.f32 %v1271_v52, 0.0 }
 0x420   :  { %353 = vmatmul.f32.vlgmr.msrb.gmra.mxu2 %v334_v53 }
 0x421   :  { %505 = vmatpush.msrb.mxu2 %v808_v4 }
 0x423   :  { %506 = vmatpush.msrb.mxu2 %v817_v6 }
 0x425   :  { %507 = vmatpush.msrb.mxu2 %v826_v8 }
 0x427   :  { %508 = vmatpush.msrb.mxu2 %v835_v10 }
 0x429   :  { %509 = vmatpush.msrb.mxu2 %v844_v12 }
 0x42b   :  { %510 = vmatpush.msrb.mxu2 %v853_v14 }
 0x42d   :  { %511 = vmatpush.msrb.mxu2 %v862_v16 }
 0x42f   :  { %512 = vmatpush.msrb.mxu2 %v871_v18 }
 0x431   :  { %513 = vmatpush.msrb.mxu2 %v880_v20 }
 0x433   :  { %514 = vmatpush.msrb.mxu2 %v889_v22 }
 0x435   :  { %515 = vmatpush.msrb.mxu2 %v898_v24 }
 0x437   :  { %516 = vmatpush.msrb.mxu2 %v907_v26 }
 0x439   :  { %517 = vmatpush.msrb.mxu2 %v919_v29 }
 0x43b   :  { %518 = vmatpush.msrb.mxu2 %v927_v30 }
 0x43d   :  { %519 = vmatpush.msrb.mxu2 %v936_v31 }
 0x43f   :  { %520 = vmatpush.msrb.mxu2 %v948_v33 }
 0x4a3   :  { %v354_v57 = vpop.f32.mrf.mxu2 }
 0x4a4   :  { %v355_v58 = vadd.f32 %v354_v57, %v109_v56 }
 0x4a6   :  { %730 = vtanh.f32 %v355_v58 }
 0x4ac   :  { %v1294_v59 = vpop.eup %730 }
 0x4ad   :  { %v358_v60 = vmax.f32 %v1294_v59, 0.0 }
 0x4af   :  { %377 = vmatmul.f32.vlgmr.msrb.gmra.mxu3 %v358_v60 }
 0x4b0   :  { %529 = vmatpush.msrb.mxu3 %v808_v4  ;;  %v112_v4 = vadd.f32 %v1081_v50, %v1136_v62 }
 0x4b2   :  { %530 = vmatpush.msrb.mxu3 %v817_v6 }
 0x4b4   :  { %531 = vmatpush.msrb.mxu3 %v826_v8 }
 0x4b6   :  { %532 = vmatpush.msrb.mxu3 %v835_v10 }
 0x4b8   :  { %533 = vmatpush.msrb.mxu3 %v844_v12 }
 0x4ba   :  { %534 = vmatpush.msrb.mxu3 %v853_v14  ;;  %v115_v14 = vadd.f32 %v1081_v50, %v1138_v63 }
 0x4bc   :  { %535 = vmatpush.msrb.mxu3 %v862_v16 }
 0x4be   :  { %536 = vmatpush.msrb.mxu3 %v871_v18 }
 0x4c0   :  { %537 = vmatpush.msrb.mxu3 %v880_v20 }
 0x4c2   :  { %538 = vmatpush.msrb.mxu3 %v889_v22 }
 0x4c4   :  { %539 = vmatpush.msrb.mxu3 %v898_v24  ;;  %v584_v24 = vld [vmem:[%s1479_s5 + $0x78] sm:$0xff] }
 0x4c5   :  { %589 = vmatpush.msrb.mxu0 %v584_v24 }
 0x4c6   :  { %540 = vmatpush.msrb.mxu3 %v907_v26  ;;  %v583_v26 = vld [vmem:[%s1479_s5 + $0x70] sm:$0xff] }
 0x4c7   :  { %590 = vmatpush.msrb.mxu0 %v583_v26 }
 0x4c8   :  { %541 = vmatpush.msrb.mxu3 %v919_v29  ;;  %v582_v29 = vld [vmem:[%s1479_s5 + $0x68] sm:$0xff] }
 0x4c9   :  { %591 = vmatpush.msrb.mxu0 %v582_v29 }
 0x4ca   :  { %542 = vmatpush.msrb.mxu3 %v927_v30  ;;  %v581_v30 = vld [vmem:[%s1479_s5 + $0x60] sm:$0xff] }
 0x4cb   :  { %592 = vmatpush.msrb.mxu0 %v581_v30 }
 0x4cc   :  { %543 = vmatpush.msrb.mxu3 %v936_v31  ;;  %v580_v31 = vld [vmem:[%s1479_s5 + $0x58] sm:$0xff] }
 0x4cd   :  { %593 = vmatpush.msrb.mxu0 %v580_v31 }
 0x4ce   :  { %544 = vmatpush.msrb.mxu3 %v948_v33  ;;  %v579_v33 = vld [vmem:[%s1479_s5 + $0x50] sm:$0xff] }
 0x4cf   :  { %594 = vmatpush.msrb.mxu0 %v579_v33 }
 0x4d1   :  { %595 = vmatpush.msrb.mxu0 %v578_v5  ;;  %v133_v5 = vadd.f32 %v1081_v50, %v1175_v19 }
 0x4d3   :  { %596 = vmatpush.msrb.mxu0 %v577_v7 }
 0x4d5   :  { %597 = vmatpush.msrb.mxu0 %v576_v1 }
 0x4d7   :  { %598 = vmatpush.msrb.mxu0 %v575_v21 }
 0x4d9   :  { %599 = vmatpush.msrb.mxu0 %v574_v23 }
 0x4db   :  { %600 = vmatpush.msrb.mxu0 %v573_v25 }
 0x4dd   :  { %601 = vmatpush.msrb.mxu0 %v572_v32 }
 0x4df   :  { %602 = vmatpush.msrb.mxu0 %v571_v34 }
 0x4e1   :  { %603 = vmatpush.msrb.mxu0 %v570_v35 }
 0x4e3   :  { %604 = vmatpush.msrb.mxu0 %v569_v38 }
 0x532   :  { %v378_v6 = vpop.f32.mrf.mxu3 }
 0x533   :  { %v379_v8 = vadd.f32 %v378_v6, %v112_v4 }
 0x535   :  { %732 = vtanh.f32 %v379_v8 }
 0x53b   :  { %v1317_v10 = vpop.eup %732 }
 0x53c   :  { %v382_v12 = vmax.f32 %v1317_v10, 0.0 }
 0x53e   :  { %401 = vmatmul.f32.vlgmr.msra.gmra.mxu1 %v382_v12 }
 0x5bb   :  { %v402_v16 = vpop.f32.mrf.mxu1 }
 0x5bc   :  { %v403_v18 = vadd.f32 %v402_v16, %v115_v14  ;;  %v127_v16 = vadd.f32 %v1081_v50, %v1171_v15  ;;  %v130_v15 = vadd.f32 %v1081_v50, %v1173_v17 }
 0x5be   :  { %734 = vtanh.f32 %v403_v18 }
 0x5c4   :  { %v735_v20 = vpop.eup %734 }
 0x5c5   :  { %v406_v22 = vmax.f32 %v735_v20, 0.0 }
 0x5c7   :  { %425 = vmatmul.f32.vlgmr.msra.gmra.mxu2 %v406_v22 }
 0x64a   :  { %v426_v62 = vpop.f32.mrf.mxu2 }
 0x64b   :  { %v427_v63 = vadd.f32 %v426_v62, %v118_v61 }
 0x64d   :  { %736 = vtanh.f32 %v427_v63 }
 0x653   :  { %v737_v0 = vpop.eup %736 }
 0x654   :  { %v430_v3 = vmax.f32 %v737_v0, 0.0 }
 0x656   :  { %449 = vmatmul.f32.vlgmr.msra.gmra.mxu3 %v430_v3 }
 0x6d9   :  { %v450_v40 = vpop.f32.mrf.mxu3 }
 0x6da   :  { %v451_v43 = vadd.f32 %v450_v40, %v121_v39 }
 0x6dc   :  { %738 = vtanh.f32 %v451_v43 }
 0x6e2   :  { %v739_v44 = vpop.eup %738 }
 0x6e3   :  { %v454_v45 = vmax.f32 %v739_v44, 0.0 }
 0x6e5   :  { %473 = vmatmul.f32.vlgmr.msra.gmra.mxu0 %v454_v45 }
 0x6ed   :  { %605 = vmatmul.f32.vlgmr.msrb.gmra.mxu0 %v190_v55 }
 0x6f5   :  { %608 = vmatmul.f32.gmra.mxu0 %v214_v11 }
 0x6fd   :  { %611 = vmatmul.f32.gmra.mxu0 %v238_v28 }
 0x705   :  { %614 = vmatmul.f32.gmra.mxu0 %v262_v37 }
 0x70d   :  { %617 = vmatmul.f32.gmra.mxu0 %v286_v42 }
 0x715   :  { %620 = vmatmul.f32.gmra.mxu0 %v310_v47 }
 0x71d   :  { %623 = vmatmul.f32.gmra.mxu0 %v334_v53 }
 0x725   :  { %626 = vmatmul.f32.gmra.mxu0 %v358_v60 }
 0x72d   :  { %629 = vmatmul.f32.gmra.mxu0 %v382_v12 }
 0x735   :  { %632 = vmatmul.f32.gmra.mxu0 %v406_v22 }
 0x73d   :  { %635 = vmatmul.f32.gmra.mxu0 %v430_v3 }
 0x745   :  { %638 = vmatmul.f32.gmra.mxu0 %v454_v45 }
 0x762   :  { %v474_v55 = vpop.f32.mrf.mxu0 }
 0x763   :  { %v475_v2 = vadd.f32 %v474_v55, %v124_v54 }
 0x765   :  { %740 = vtanh.f32 %v475_v2 }
 0x76a   :  { %v606_v11 = vpop.f32.mrf.mxu0 }
 0x76b   :  { %v741_v27 = vpop.eup %740  ;;  %v607_v28 = vadd.f32 %v1399_v9, %v606_v11 }
 0x76c   :  { %v478_v36 = vmax.f32 %v741_v27, 0.0 }
 0x76d   :  { %654 = vst [vmem:[%s1481_s7] sm:$0xff] %v607_v28 }
 0x76e   :  { %497 = vmatmul.f32.vlgmr.msrb.gmra.mxu1 %v478_v36  ;;  %641 = vmatmul.f32.gmra.mxu0 %v478_v36 }
 0x772   :  { %v609_v13 = vpop.f32.mrf.mxu0 }
 0x773   :  { %v610_v37 = vadd.f32 %v1399_v9, %v609_v13 }
 0x775   :  { %655 = vst [vmem:[%s1481_s7 + $0x8] sm:$0xff] %v610_v37 }
 0x77a   :  { %v612_v41 = vpop.f32.mrf.mxu0 }
 0x77b   :  { %v613_v42 = vadd.f32 %v1399_v9, %v612_v41 }
 0x77d   :  { %656 = vst [vmem:[%s1481_s7 + $0x10] sm:$0xff] %v613_v42 }
 0x782   :  { %v615_v46 = vpop.f32.mrf.mxu0 }
 0x783   :  { %v616_v47 = vadd.f32 %v1399_v9, %v615_v46 }
 0x785   :  { %657 = vst [vmem:[%s1481_s7 + $0x18] sm:$0xff] %v616_v47 }
 0x78a   :  { %v618_v48 = vpop.f32.mrf.mxu0 }
 0x78b   :  { %v619_v49 = vadd.f32 %v1399_v9, %v618_v48 }
 0x78d   :  { %658 = vst [vmem:[%s1481_s7 + $0x20] sm:$0xff] %v619_v49 }
 0x792   :  { %v621_v51 = vpop.f32.mrf.mxu0 }
 0x793   :  { %v622_v52 = vadd.f32 %v1399_v9, %v621_v51 }
 0x795   :  { %659 = vst [vmem:[%s1481_s7 + $0x28] sm:$0xff] %v622_v52 }
 0x79a   :  { %v624_v53 = vpop.f32.mrf.mxu0 }
 0x79b   :  { %v625_v56 = vadd.f32 %v1399_v9, %v624_v53 }
 0x79d   :  { %660 = vst [vmem:[%s1481_s7 + $0x30] sm:$0xff] %v625_v56 }
 0x7a2   :  { %v627_v57 = vpop.f32.mrf.mxu0 }
 0x7a3   :  { %v628_v58 = vadd.f32 %v1399_v9, %v627_v57 }
 0x7a5   :  { %661 = vst [vmem:[%s1481_s7 + $0x38] sm:$0xff] %v628_v58 }
 0x7aa   :  { %v630_v59 = vpop.f32.mrf.mxu0 }
 0x7ab   :  { %v631_v60 = vadd.f32 %v1399_v9, %v630_v59 }
 0x7ad   :  { %662 = vst [vmem:[%s1481_s7 + $0x40] sm:$0xff] %v631_v60 }
 0x7b2   :  { %v633_v4 = vpop.f32.mrf.mxu0 }
 0x7b3   :  { %v634_v6 = vadd.f32 %v1399_v9, %v633_v4 }
 0x7b5   :  { %663 = vst [vmem:[%s1481_s7 + $0x48] sm:$0xff] %v634_v6 }
 0x7ba   :  { %v636_v8 = vpop.f32.mrf.mxu0 }
 0x7bb   :  { %v637_v10 = vadd.f32 %v1399_v9, %v636_v8 }
 0x7bd   :  { %664 = vst [vmem:[%s1481_s7 + $0x50] sm:$0xff] %v637_v10 }
 0x7c2   :  { %v639_v12 = vpop.f32.mrf.mxu0 }
 0x7c3   :  { %v640_v14 = vadd.f32 %v1399_v9, %v639_v12 }
 0x7c5   :  { %665 = vst [vmem:[%s1481_s7 + $0x58] sm:$0xff] %v640_v14 }
 0x7eb   :  { %v498_v18 = vpop.f32.mrf.mxu1  ;;  %v642_v20 = vpop.f32.mrf.mxu0 }
 0x7ec   :  { %v499_v22 = vadd.f32 %v498_v18, %v127_v16  ;;  %v643_v24 = vadd.f32 %v1399_v9, %v642_v20 }
 0x7ee   :  { %742 = vtanh.f32 %v499_v22  ;;  %666 = vst [vmem:[%s1481_s7 + $0x60] sm:$0xff] %v643_v24 }
 0x7f4   :  { %v743_v26 = vpop.eup %742 }
 0x7f5   :  { %v502_v29 = vmax.f32 %v743_v26, 0.0 }
 0x7f7   :  { %521 = vmatmul.f32.vlgmr.msrb.gmra.mxu2 %v502_v29  ;;  %644 = vmatmul.f32.gmra.mxu0 %v502_v29 }
 0x874   :  { %v645_v30 = vpop.f32.mrf.mxu0 }
 0x875   :  { %v646_v31 = vadd.f32 %v1399_v9, %v645_v30 }
 0x877   :  { %667 = vst [vmem:[%s1481_s7 + $0x68] sm:$0xff] %v646_v31 }
 0x87a   :  { %v522_v33 = vpop.f32.mrf.mxu2 }
 0x87b   :  { %v523_v61 = vadd.f32 %v522_v33, %v130_v15 }
 0x87d   :  { %744 = vtanh.f32 %v523_v61 }
 0x883   :  { %v745_v62 = vpop.eup %744 }
 0x884   :  { %v526_v63 = vmax.f32 %v745_v62, 0.0 }
 0x886   :  { %545 = vmatmul.f32.vlgmr.msrb.gmra.mxu3 %v526_v63  ;;  %647 = vmatmul.f32.gmra.mxu0 %v526_v63 }
 0x903   :  { %v648_v0 = vpop.f32.mrf.mxu0 }
 0x904   :  { %v649_v3 = vadd.f32 %v1399_v9, %v648_v0 }
 0x906   :  { %668 = vst [vmem:[%s1481_s7 + $0x70] sm:$0xff] %v649_v3 }
 0x909   :  { %v546_v7 = vpop.f32.mrf.mxu3 }
 0x90a   :  { %v547_v1 = vadd.f32 %v546_v7, %v133_v5 }
 0x90c   :  { %746 = vtanh.f32 %v547_v1 }
 0x912   :  { %v747_v17 = vpop.eup %746 }
 0x913   :  { %v550_v21 = vmax.f32 %v747_v17, 0.0 }
 0x915   :  { %650 = vmatmul.f32.gmra.mxu0 %v550_v21  ;;  %673 = vst [vmem:[%s1482_s8] sm:$0xff] %v550_v21 }
 0x992   :  { %v651_v23 = vpop.f32.mrf.mxu0 }
 0x993   :  { %v652_v25 = vadd.f32 %v1399_v9, %v651_v23 }
 0x995   :  { %669 = vst [vmem:[%s1481_s7 + $0x78] sm:$0xff] %v652_v25 }

</bundles_post_ra>
